<compile_context>
chip_gen: v6e
topology: v6e:2x2x1
jax: 0.10.0
libtpu: 0.0.40
codegen_flags: <defaults>
</compile_context>

<pallas_src>
import jax
import jax.numpy as jnp
from jax.experimental import pallas as pl
from jax.experimental.pallas import tpu as pltpu


def _round_up(x, m):
    return (x + m - 1) // m * m


def _make_dbb_cache_kernel(p_valid, mode, maximize):
    """Solution-pool lookup kernel.

    mode:
      "f32"        — inputs (c, pool_f32); f32 objective, f32 gather.
      "mixed"      — inputs (c, pool_f32, pool_bf16); f32 objective, bf16 gather.
      "bf16_split" — inputs (c, pool_bf16); split-bf16 objective, bf16 gather.
    """
    neutral = -jnp.inf if maximize else jnp.inf
    dn = (((1,), (1,)), ((), ()))  # contract dim 1 of both operands (no .T)

    def kernel(*refs):
        if mode == "mixed":
            c_ref, pool_ref, pool_b_ref, sol_ref = refs
        else:
            c_ref, pool_ref, sol_ref = refs

        c = c_ref[...]                                          # (TB, Dp) f32

        if mode == "bf16_split":
            # Pool entries are exactly representable in bf16; split
            # c = c_hi + c_lo and run two native-bf16 MXU passes instead of one
            # emulated f32 pass (~2x faster, near-f32-exact).
            gpool = pool_ref[...]                               # (Pp, Dp) bf16
            c_hi = c.astype(jnp.bfloat16)
            c_lo = (c - c_hi.astype(jnp.float32)).astype(jnp.bfloat16)
            obj = (jax.lax.dot_general(c_hi, gpool, dimension_numbers=dn,
                                       preferred_element_type=jnp.float32)
                   + jax.lax.dot_general(c_lo, gpool, dimension_numbers=dn,
                                         preferred_element_type=jnp.float32))
        elif mode == "mixed":
            # bf16 pool was cast once in the wrapper — no per-step VPU cast.
            gpool = pool_b_ref[...]                             # (Pp, Dp) bf16
            obj = jax.lax.dot_general(c, pool_ref[...], dimension_numbers=dn,
                                      preferred_element_type=jnp.float32)
        else:  # "f32"
            gpool = pool_ref[...]                               # (Pp, Dp) f32
            obj = jax.lax.dot_general(c, gpool, dimension_numbers=dn,
                                      preferred_element_type=jnp.float32)

        p_pad = obj.shape[1]
        col_iota = jax.lax.broadcasted_iota(jnp.int32, obj.shape, 1)  # (TB,Pp)

        # Padded (all-zero) pool rows must never win.
        if p_valid < p_pad:
            obj = jnp.where(col_iota < p_valid, obj, neutral)

        # Row-wise arg{min,max} with first-occurrence tie-breaking (np semantics).
        best = (jnp.max if maximize else jnp.min)(obj, axis=1, keepdims=True)
        idx = jnp.min(jnp.where(obj == best, col_iota, p_pad),
                      axis=1, keepdims=True)                          # (TB, 1)

        # Gather solpool[idx] via a one-hot matmul (stays on the MXU).
        onehot = (col_iota == idx).astype(gpool.dtype)                # (TB, Pp)
        sol_ref[...] = jnp.dot(onehot, gpool,
                               preferred_element_type=jnp.float32)    # (TB, Dp)

    return kernel


def _tpu_vmem_capacity_bytes():
    try:
        return int(pltpu.get_tpu_info().vmem_capacity_bytes)
    except Exception:
        return 64 << 20   # conservative fallback (v7x per-TensorCore VMEM)


def blackbox_opt_forward(pred_cost, solpool, *, maximize=False, tb_max=None,
                         fast_objective=False):
    """Forward pass of blackboxOpt (cache-in-pass branch).

    pred_cost: (B, D) predicted cost vectors.
    solpool:   (P, D) cached solutions.
    Returns:   (B, D) float32 selected solutions.
    """
    pred_cost = jnp.asarray(pred_cost, jnp.float32)
    solpool = jnp.asarray(solpool, jnp.float32)
    B, D = pred_cost.shape
    P, D2 = solpool.shape
    assert D == D2, "pred_cost and solpool feature dims must match"

    # ---- lane-dense padding (skip the copy when already aligned) ----
    Dp = _round_up(D, 128)
    Pp = _round_up(P, 128)
    pool_pad = solpool if (Dp == D and Pp == P) else jnp.pad(
        solpool, ((0, Pp - P), (0, Dp - D)))

    # bf16 gather is only lossless if every pool entry round-trips through
    # bf16 (true for 0/1 combinatorial solutions); otherwise fall back to f32.
    # TODO(synk): hoist this check + the padded/bf16 pool out of the per-call
    # path when solpool is reused across training steps.
    pool_bf16 = pool_pad.astype(jnp.bfloat16)
    bf16_lossless = bool(jnp.all(pool_bf16.astype(jnp.float32) == pool_pad))
    if bf16_lossless:
        mode = "bf16_split" if fast_objective else "mixed"
    else:
        mode = "f32"

    # ---- tile sizing (generation-aware) ----
    device_kind = jax.devices()[0].device_kind.lower()
    if tb_max is None:
        tb_max = 128 if "v5" in device_kind else 256   # v5e MXU is 4x(128x128)

    TB = min(tb_max, _round_up(B, 8))
    if B > 8:
        # Keep >= 2 batch tiles so the "parallel" axis shards across both
        # TensorCores on v7x and the pipeline can overlap DMA with compute.
        TB = min(TB, max(8, _round_up((B + 1) // 2, 8)))

    # ---- VMEM accounting (shrink TB rather than silently clamping) ----
    pool_bytes_per_buf = {"f32": 4, "mixed": 6, "bf16_split": 2}[mode] * Pp * Dp
    onehot_itemsize = 4 if mode == "f32" else 2

    def vmem_bytes(tb, pool_bufs):
        return (2 * tb * Dp * 4                      # cost tiles (double-buffered)
                + 2 * tb * Dp * 4                    # output tiles (double-buffered)
                + pool_bufs * pool_bytes_per_buf     # resident pool copy/copies
                + tb * Pp * (4 + 4 + 4 + onehot_itemsize))  # obj/iota/mask/one-hot

    vmem_cap = min((_tpu_vmem_capacity_bytes() * 3) // 4, 100 << 20)
    while TB > 8 and vmem_bytes(TB, 1) > vmem_cap:
        TB = max(8, _round_up(TB // 2, 8))
    # Budget assuming the double-buffered fallback path, with 25% slack.
    vmem_limit = int(min(max(vmem_bytes(TB, 2) * 5 // 4, 16 << 20), vmem_cap))

    Bp = _round_up(B, TB)
    c_pad = pred_cost if (Bp == B and Dp == D) else jnp.pad(
        pred_cost, ((0, Bp - B), (0, Dp - D)))

    kernel = _make_dbb_cache_kernel(P, mode, maximize)

    if mode == "mixed":
        operands = (c_pad, pool_pad, pool_bf16)
    elif mode == "bf16_split":
        operands = (c_pad, pool_bf16)
    else:
        operands = (c_pad, pool_pad)

    def call(single_buffer_pool):
        pool_kwargs = (dict(pipeline_mode=pl.Buffered(1))
                       if single_buffer_pool else {})
        in_specs = [pl.BlockSpec((TB, Dp), lambda i: (i, 0))]      # cost tiles
        for _ in range(len(operands) - 1):                          # pool(s)
            in_specs.append(
                pl.BlockSpec((Pp, Dp), lambda i: (0, 0), **pool_kwargs))
        return pl.pallas_call(
            kernel,
            out_shape=jax.ShapeDtypeStruct((Bp, Dp), jnp.float32),
            grid=(Bp // TB,),
            in_specs=in_specs,
            out_specs=pl.BlockSpec((TB, Dp), lambda i: (i, 0)),
            compiler_params=pltpu.CompilerParams(
                dimension_semantics=("parallel",),   # shards batch tiles (v7x)
                vmem_limit_bytes=vmem_limit),
        )(*operands)

    try:
        # Single-buffer the resident pool: its index map is constant, so
        # double-buffering it only wastes VMEM.
        out = call(single_buffer_pool=True)
    except Exception:
        # Some Pallas versions may reject Buffered(1); correctness over the
        # VMEM saving — fall back to default buffering.
        out = call(single_buffer_pool=False)

    return out[:B, :D]


def _reference_forward(pred_cost, solpool, maximize=False):
    """Pure-JAX reference mirroring _cache_in_pass."""
    obj = pred_cost @ solpool.T
    ind = jnp.argmax(obj, axis=1) if maximize else jnp.argmin(obj, axis=1)
    return solpool[ind].astype(jnp.float32)


if __name__ == "__main__":
    key = jax.random.PRNGKey(0)
    k_cost, k_pool = jax.random.split(key)

    B, D, P = 8, 32, 16   # batch of cost vectors, cost dim, solution-pool size

    # Predicted cost vectors (what the upstream predictor would output).
    pred_cost = jax.random.normal(k_cost, (B, D), dtype=jnp.float32)

    # Deterministic synthetic solution pool (binary solutions, as in
    # dataset.sols for combinatorial problems like shortest path / knapsack).
    solpool = jax.random.bernoulli(k_pool, p=0.5, shape=(P, D)).astype(jnp.float32)

    sol = blackbox_opt_forward(pred_cost, solpool)
    sol = jax.block_until_ready(sol)

    ref = _reference_forward(pred_cost, solpool)
    assert sol.shape == (B, D) and sol.dtype == jnp.float32
    assert jnp.allclose(sol, ref), "Pallas kernel mismatch vs reference"

    print("KERNEL_OK")
</pallas_src>

<mosaic_0001>
module attributes {stable_mosaic.version = 11 : i64} {
  func.func @kernel(%arg0: i32, %arg1: memref<8x128xf32, #tpu.memory_space<vmem>>, %arg2: memref<128x128xf32, #tpu.memory_space<vmem>>, %arg3: memref<128x128xbf16, #tpu.memory_space<vmem>>, %arg4: memref<8x128xf32, #tpu.memory_space<vmem>>) attributes {dimension_semantics = [#tpu.dimension_semantics<parallel>], iteration_bounds = array<i64: 1>, scalar_prefetch = 0 : i64, scratch_operands = 0 : i64, tpu.core_type = #tpu.core_type<tc>, window_params = [{transform_indices = @transform_0, window_bounds = array<i64: 8, 128>}, {pipeline_mode = #tpu.pipeline_mode<synchronous>, transform_indices = @transform_1, window_bounds = array<i64: 128, 128>}, {pipeline_mode = #tpu.pipeline_mode<synchronous>, transform_indices = @transform_2, window_bounds = array<i64: 128, 128>}, {transform_indices = @transform_3, window_bounds = array<i64: 8, 128>}]} {
    %c0 = arith.constant 0 : index
    %c0_0 = arith.constant 0 : index
    %0 = vector.load %arg1[%c0, %c0_0] : memref<8x128xf32, #tpu.memory_space<vmem>>, vector<8x128xf32>
    %c0_1 = arith.constant 0 : index
    %c0_2 = arith.constant 0 : index
    %1 = vector.load %arg3[%c0_1, %c0_2] : memref<128x128xbf16, #tpu.memory_space<vmem>>, vector<128x128xbf16>
    %c0_3 = arith.constant 0 : index
    %c0_4 = arith.constant 0 : index
    %2 = vector.load %arg2[%c0_3, %c0_4] : memref<128x128xf32, #tpu.memory_space<vmem>>, vector<128x128xf32>
    %cst = arith.constant dense<0.000000e+00> : vector<8x128xf32>
    %3 = tpu.matmul %0, %2, %cst {dimension_numbers = #tpu.dot_dimension_numbers<[1], [1], [0], [0], [0, 0, 1, 0], [], []>} : vector<8x128xf32>, vector<128x128xf32>, vector<8x128xf32> -> vector<8x128xf32>
    %4 = tpu.iota {dimensions = array<i32: 1>} : vector<8x128xi32>
    %c16_i32 = arith.constant 16 : i32
    %5 = vector.broadcast %c16_i32 : i32 to vector<8x128xi32>
    %6 = arith.cmpi slt, %4, %5 : vector<8x128xi32>
    %cst_5 = arith.constant 0x7F800000 : f32
    %7 = vector.broadcast %cst_5 : f32 to vector<8x128xf32>
    %8 = arith.select %6, %3, %7 : vector<8x128xi1>, vector<8x128xf32>
    %cst_6 = arith.constant dense<0x7F800000> : vector<8xf32>
    %9 = vector.multi_reduction <minimumf>, %8, %cst_6 [1] : vector<8x128xf32> to vector<8xf32>
    %10 = vector.shape_cast %9 : vector<8xf32> to vector<8x1xf32>
    %11 = vector.broadcast %10 : vector<8x1xf32> to vector<8x128xf32>
    %12 = arith.cmpf oeq, %8, %11 : vector<8x128xf32>
    %c128_i32 = arith.constant 128 : i32
    %13 = vector.broadcast %c128_i32 : i32 to vector<8x128xi32>
    %14 = arith.select %12, %4, %13 : vector<8x128xi1>, vector<8x128xi32>
    %cst_7 = arith.constant dense<2147483647> : vector<8xi32>
    %15 = vector.multi_reduction <minsi>, %14, %cst_7 [1] : vector<8x128xi32> to vector<8xi32>
    %16 = vector.shape_cast %15 : vector<8xi32> to vector<8x1xi32>
    %17 = vector.broadcast %16 : vector<8x1xi32> to vector<8x128xi32>
    %18 = arith.cmpi eq, %4, %17 : vector<8x128xi32>
    %19 = arith.extui %18 : vector<8x128xi1> to vector<8x128xi32>
    %20 = arith.sitofp %19 : vector<8x128xi32> to vector<8x128xf32>
    %21 = arith.truncf %20 : vector<8x128xf32> to vector<8x128xbf16>
    %cst_8 = arith.constant dense<0.000000e+00> : vector<8x128xf32>
    %22 = tpu.matmul %21, %1, %cst_8 {dimension_numbers = #tpu.dot_dimension_numbers<[1], [0], [0], [1], [0, 0, 1, 1], [], []>} : vector<8x128xbf16>, vector<128x128xbf16>, vector<8x128xf32> -> vector<8x128xf32>
    %c0_9 = arith.constant 0 : index
    %c0_10 = arith.constant 0 : index
    %23 = vector.load %arg4[%c0_9, %c0_10] : memref<8x128xf32, #tpu.memory_space<vmem>>, vector<8x128xf32>
    tpu.vector_store %arg4[%c0_9, %c0_10], %22 {strides = array<i32>} : memref<8x128xf32, #tpu.memory_space<vmem>>, vector<8x128xf32>,
    return
  }
  func.func @transform_0(%arg0: i32) -> (i32, i32) {
    %c0_i32 = arith.constant 0 : i32
    %c0_i32_0 = arith.constant 0 : i32
    return %arg0, %c0_i32 : i32, i32
  }
  func.func @transform_1(%arg0: i32) -> (i32, i32) {
    %c0_i32 = arith.constant 0 : i32
    %c0_i32_0 = arith.constant 0 : i32
    %c0_i32_1 = arith.constant 0 : i32
    return %c0_i32, %c0_i32_0 : i32, i32
  }
  func.func @transform_2(%arg0: i32) -> (i32, i32) {
    %c0_i32 = arith.constant 0 : i32
    %c0_i32_0 = arith.constant 0 : i32
    %c0_i32_1 = arith.constant 0 : i32
    return %c0_i32, %c0_i32_0 : i32, i32
  }
  func.func @transform_3(%arg0: i32) -> (i32, i32) {
    %c0_i32 = arith.constant 0 : i32
    %c0_i32_0 = arith.constant 0 : i32
    return %arg0, %c0_i32 : i32, i32
  }
}

module attributes {stable_mosaic.version = 11 : i64} {
  func.func @kernel(%arg0: i32, %arg1: memref<8x128xf32, #tpu.memory_space<vmem>>, %arg2: memref<128x128xf32, #tpu.memory_space<vmem>>, %arg3: memref<128x128xbf16, #tpu.memory_space<vmem>>, %arg4: memref<8x128xf32, #tpu.memory_space<vmem>>) attributes {dimension_semantics = [#tpu.dimension_semantics<parallel>], iteration_bounds = array<i64: 1>, scalar_prefetch = 0 : i64, scratch_operands = 0 : i64, tpu.core_type = #tpu.core_type<tc>, window_params = [{transform_indices = @transform_0, window_bounds = array<i64: 8, 128>}, {pipeline_mode = #tpu.pipeline_mode<synchronous>, transform_indices = @transform_1, window_bounds = array<i64: 128, 128>}, {pipeline_mode = #tpu.pipeline_mode<synchronous>, transform_indices = @transform_2, window_bounds = array<i64: 128, 128>}, {transform_indices = @transform_3, window_bounds = array<i64: 8, 128>}]} {
    %c0 = arith.constant 0 : index
    %c0_0 = arith.constant 0 : index
    %0 = vector.load %arg1[%c0, %c0_0] : memref<8x128xf32, #tpu.memory_space<vmem>>, vector<8x128xf32>
    %c0_1 = arith.constant 0 : index
    %c0_2 = arith.constant 0 : index
    %1 = vector.load %arg3[%c0_1, %c0_2] : memref<128x128xbf16, #tpu.memory_space<vmem>>, vector<128x128xbf16>
    %c0_3 = arith.constant 0 : index
    %c0_4 = arith.constant 0 : index
    %2 = vector.load %arg2[%c0_3, %c0_4] : memref<128x128xf32, #tpu.memory_space<vmem>>, vector<128x128xf32>
    %cst = arith.constant dense<0.000000e+00> : vector<8x128xf32>
    %3 = tpu.matmul %0, %2, %cst {dimension_numbers = #tpu.dot_dimension_numbers<[1], [1], [0], [0], [0, 0, 1, 0], [], []>} : vector<8x128xf32>, vector<128x128xf32>, vector<8x128xf32> -> vector<8x128xf32>
    %4 = tpu.iota {dimensions = array<i32: 1>} : vector<8x128xi32>
    %c16_i32 = arith.constant 16 : i32
    %5 = vector.broadcast %c16_i32 : i32 to vector<8x128xi32>
    %6 = arith.cmpi slt, %4, %5 : vector<8x128xi32>
    %cst_5 = arith.constant 0x7F800000 : f32
    %7 = vector.broadcast %cst_5 : f32 to vector<8x128xf32>
    %8 = arith.select %6, %3, %7 : vector<8x128xi1>, vector<8x128xf32>
    %cst_6 = arith.constant dense<0x7F800000> : vector<8xf32>
    %9 = vector.multi_reduction <minimumf>, %8, %cst_6 [1] : vector<8x128xf32> to vector<8xf32>
    %10 = vector.shape_cast %9 : vector<8xf32> to vector<8x1xf32>
    %11 = vector.broadcast %10 : vector<8x1xf32> to vector<8x128xf32>
    %12 = arith.cmpf oeq, %8, %11 : vector<8x128xf32>
    %c128_i32 = arith.constant 128 : i32
    %13 = vector.broadcast %c128_i32 : i32 to vector<8x128xi32>
    %14 = arith.select %12, %4, %13 : vector<8x128xi1>, vector<8x128xi32>
    %cst_7 = arith.constant dense<2147483647> : vector<8xi32>
    %15 = vector.multi_reduction <minsi>, %14, %cst_7 [1] : vector<8x128xi32> to vector<8xi32>
    %16 = vector.shape_cast %15 : vector<8xi32> to vector<8x1xi32>
    %17 = vector.broadcast %16 : vector<8x1xi32> to vector<8x128xi32>
    %18 = arith.cmpi eq, %4, %17 : vector<8x128xi32>
    %19 = arith.extui %18 : vector<8x128xi1> to vector<8x128xi32>
    %20 = arith.sitofp %19 : vector<8x128xi32> to vector<8x128xf32>
    %21 = arith.truncf %20 : vector<8x128xf32> to vector<8x128xbf16>
    %cst_8 = arith.constant dense<0.000000e+00> : vector<8x128xf32>
    %22 = tpu.matmul %21, %1, %cst_8 {dimension_numbers = #tpu.dot_dimension_numbers<[1], [0], [0], [1], [0, 0, 1, 1], [], []>} : vector<8x128xbf16>, vector<128x128xbf16>, vector<8x128xf32> -> vector<8x128xf32>
    %c0_9 = arith.constant 0 : index
    %c0_10 = arith.constant 0 : index
    %23 = vector.load %arg4[%c0_9, %c0_10] : memref<8x128xf32, #tpu.memory_space<vmem>>, vector<8x128xf32>
    tpu.vector_store %arg4[%c0_9, %c0_10], %22 {strides = array<i32>} : memref<8x128xf32, #tpu.memory_space<vmem>>, vector<8x128xf32>,
    return
  }
  func.func @transform_0(%arg0: i32) -> (i32, i32) {
    %c0_i32 = arith.constant 0 : i32
    %c0_i32_0 = arith.constant 0 : i32
    return %arg0, %c0_i32 : i32, i32
  }
  func.func @transform_1(%arg0: i32) -> (i32, i32) {
    %c0_i32 = arith.constant 0 : i32
    %c0_i32_0 = arith.constant 0 : i32
    %c0_i32_1 = arith.constant 0 : i32
    return %c0_i32, %c0_i32_0 : i32, i32
  }
  func.func @transform_2(%arg0: i32) -> (i32, i32) {
    %c0_i32 = arith.constant 0 : i32
    %c0_i32_0 = arith.constant 0 : i32
    %c0_i32_1 = arith.constant 0 : i32
    return %c0_i32, %c0_i32_0 : i32, i32
  }
  func.func @transform_3(%arg0: i32) -> (i32, i32) {
    %c0_i32 = arith.constant 0 : i32
    %c0_i32_0 = arith.constant 0 : i32
    return %arg0, %c0_i32 : i32, i32
  }
}

</mosaic_0001>

<bundles_post_ra>
// kernel: tpu_custom_call.1
= control target key start
LH: loop header
LB: loop body
LE: loop exit
PB: predicated region body
PF: predicated region fallthrough
CT: control target
= control target key end

     0   :  { %8 = vsyncpa [#allocation3], 0  ;;  %s555_s0 = inlined_call_operand.hbm [shape: f32[8,128], index: 0, kind: input, shape index: {}]   ;;  %s556_s1 = inlined_call_operand.hbm [shape: f32[128,128], index: 1, kind: input, shape index: {}]   ;;  %s557_s2 = inlined_call_operand.hbm [shape: bf16[128,128], index: 2, kind: input, shape index: {}]   ;;  %s558_s3 = inlined_call_operand.hbm [shape: f32[8,128], index: 3, kind: output, shape index: {}]  }
   0x1   :  { %9 = vsyncpa [#allocation6], 0 }
   0x2   :  { %10 = vsyncpa [#allocation4], 0  ;;  %s486_s12 = smov [#allocation5]  }
   0x3   :  { %s26_s13 = sshll.u32 %s486_s12, 4  ;;  %s27_s13 = int_to_ptr.vmem [resolvable:$true] %s26_s13 }
   0x4   :  { %s408_s14 = scalar_lea.vmem %s27_s13, 2048  ;;  %p413_p1 = scmp.lt.s32.totalorder %s27_s13, %s27_s13 }
   0x5   :  { %p409_p0 = scmp.ne.s32.totalorder %s27_s13, %s408_s14  ;;  %p414_p2 = scmp.lt.s32.totalorder %s408_s14, %s408_s14 }
   0x7   :  { %p415_p3 = por %p414_p2, %p413_p1 }
   0x9   :  { %p416_p4 = pnand %p415_p3, %p409_p0 }
   0xb   :  { %419 = shalt.err (!%p416_p4)
}
   0xc   :  { %s487_s15 = smov 128   ;;  %s488_s16 = smov 8  }
   0xd   :  { %32 = dma.hbm_to_vmem [thread:$0]  %s556_s1, 2048, %s27_s13, [#allocation6], %s487_s15, %s487_s15, %s488_s16  }
   0xe   :  { %s489_s19 = smov [#allocation2]   ;;  %s490_s21 = smov [#allocation7]  }
   0xf   :  { %s17_s20 = sshll.u32 %s489_s19, 4  ;;  %s38_s22 = sshll.u32 %s490_s21, 4  ;;  %s18_s20 = int_to_ptr.vmem [resolvable:$true] %s17_s20  ;;  %s39_s22 = int_to_ptr.vmem [resolvable:$true] %s38_s22 }
  0x10   :  { %s428_s23 = scalar_lea.vmem %s18_s20, 128  ;;  %p433_p6 = scmp.lt.s32.totalorder %s18_s20, %s18_s20 }
  0x11   :  { %p429_p5 = scmp.ne.s32.totalorder %s18_s20, %s428_s23  ;;  %p434_p7 = scmp.lt.s32.totalorder %s428_s23, %s428_s23 }
  0x13   :  { %p435_p8 = por %p434_p7, %p433_p6 }
  0x15   :  { %p436_p9 = pnand %p435_p8, %p429_p5 }
  0x17   :  { %439 = shalt.err (!%p436_p9)
}
  0x18   :  { %20 = dma.hbm_to_vmem [thread:$0]  %s555_s0, 128, %s18_s20, [#allocation3]  }
  0x19   :  { %s448_s26 = scalar_lea.vmem %s39_s22, 1024  ;;  %p453_p11 = scmp.lt.s32.totalorder %s39_s22, %s39_s22 }
  0x1a   :  { %p449_p10 = scmp.ne.s32.totalorder %s39_s22, %s448_s26  ;;  %p454_p12 = scmp.lt.s32.totalorder %s448_s26, %s448_s26 }
  0x1c   :  { %p455_p13 = por %p454_p12, %p453_p11 }
  0x1e   :  { %p456_p0 = pnand %p455_p13, %p449_p10 }
  0x20   :  { %459 = shalt.err (!%p456_p0)
}
  0x21   :  { %s491_s1 = smov 64   ;;  %s492_s27 = smov 4  }
  0x22   :  { %44 = dma.hbm_to_vmem [thread:$0]  %s557_s2, 1024, %s39_s22, [#allocation6], %s491_s1, %s491_s1, %s492_s27  }
  0x23   :  { %480 = dma.done.wait [#allocation3], 128  }
  0x24   :  { %481 = vsyncadd [#allocation3], 4294967168 }
  0x25   :  { %482 = dma.done.wait [#allocation6], 3072  }
  0x26   :  { %483 = vsyncadd [#allocation6], 4294964224  ;;  %v493_v0 = vmov 0.0   ;;  %vm494_vm0 = vmmov 0   ;;  %v87_v1 = vld [vmem:[#allocation5 + $0x78] sm:$0xff]  ;;  %v86_v2 = vld [vmem:[#allocation5 + $0x70] sm:$0xff]  ;;  %v158_v18 = vlaneseq }
  0x27   :  { %326 = vmatprep.subr.mxu0 %v493_v0  ;;  %358 = vmatprep.mubr.msk.f32.mxu0 %vm494_vm0, %v493_v0  ;;  %v85_v3 = vld [vmem:[#allocation5 + $0x68] sm:$0xff]  ;;  %v84_v4 = vld [vmem:[#allocation5 + $0x60] sm:$0xff]  ;;  %v83_v5 = vld [vmem:[#allocation5 + $0x58] sm:$0xff]  ;;  %v495_v44 = vmov 1.0|1.0   ;;  %s496_s0 = smov [#allocation8]  }
  0x28   :  { %361 = vmatprep.subr.bf16.mxu1 %v493_v0  ;;  %377 = vmatprep.mubr.msk.bf16.mxu1 %vm494_vm0, %v493_v0  ;;  %v82_v6 = vld [vmem:[#allocation5 + $0x50] sm:$0xff]  ;;  %v81_v7 = vld [vmem:[#allocation5 + $0x48] sm:$0xff]  ;;  %v80_v8 = vld [vmem:[#allocation5 + $0x40] sm:$0xff]  ;;  %v159_v19 = vand.u32 127, %v158_v18  ;;  %s279_s2 = sshll.u32 %s496_s0, 4  ;;  %s280_s2 = int_to_ptr.vmem [resolvable:$true] %s279_s2 }
  0x29   :  { %327 = vmatpush3.xpose.msra.mxu0 %v87_v1  ;;  %v79_v9 = vld [vmem:[#allocation5 + $0x38] sm:$0xff]  ;;  %v78_v10 = vld [vmem:[#allocation5 + $0x30] sm:$0xff]  ;;  %v77_v11 = vld [vmem:[#allocation5 + $0x28] sm:$0xff]  ;;  %s460_s30 = scalar_lea.vmem %s280_s2, 128  ;;  %p465_p2 = scmp.lt.s32.totalorder %s280_s2, %s280_s2 }
  0x2a   :  { %328 = vmatprep.subr.mxu0 %v493_v0  ;;  %v76_v12 = vld [vmem:[#allocation5 + $0x20] sm:$0xff]  ;;  %v75_v13 = vld [vmem:[#allocation5 + $0x18] sm:$0xff]  ;;  %v74_v14 = vld [vmem:[#allocation5 + $0x10] sm:$0xff]  ;;  %vm160_vm1 = vcmp.lt.s32.totalorder %v159_v19, 16  ;;  %p461_p1 = scmp.ne.s32.totalorder %s280_s2, %s460_s30  ;;  %p466_p3 = scmp.lt.s32.totalorder %s460_s30, %s460_s30 }
  0x2b   :  { %v73_v15 = vld [vmem:[#allocation5 + $0x8] sm:$0xff]  ;;  %v72_v16 = vld [vmem:[#allocation5] sm:$0xff]  ;;  %v55_v17 = vld [vmem:[#allocation2] sm:$0xff] }
  0x2c   :  { %v392_v27 = vld [vmem:[#allocation7 + $0x38] sm:$0xff]   ;;  %v393_v28 = vld [vmem:[#allocation7 + $0x30] sm:$0xff]   ;;  %v394_v29 = vld [vmem:[#allocation7 + $0x28] sm:$0xff]   ;;  %p467_p4 = por %p466_p3, %p465_p2 }
  0x2d   :  { %329 = vmatpush3.xpose.msra.mxu0 %v86_v2  ;;  %362 = vmatpush3.bf16.msra.mxu1 %v392_v27  ;;  %v395_v30 = vld [vmem:[#allocation7 + $0x20] sm:$0xff]   ;;  %v396_v31 = vld [vmem:[#allocation7 + $0x18] sm:$0xff]   ;;  %v397_v32 = vld [vmem:[#allocation7 + $0x10] sm:$0xff]  }
  0x2e   :  { %330 = vmatprep.subr.mxu0 %v493_v0  ;;  %363 = vmatprep.subr.bf16.mxu1 %v493_v0  ;;  %v398_v33 = vld [vmem:[#allocation7 + $0x8] sm:$0xff]   ;;  %v399_v38 = vld [vmem:[#allocation7] sm:$0xff]   ;;  %p468_p5 = pnand %p467_p4, %p461_p1 }
  0x31   :  { %331 = vmatpush3.xpose.msra.mxu0 %v85_v3  ;;  %364 = vmatpush3.bf16.msra.mxu1 %v393_v28 }
  0x32   :  { %332 = vmatprep.subr.mxu0 %v493_v0  ;;  %365 = vmatprep.subr.bf16.mxu1 %v493_v0 }
  0x35   :  { %333 = vmatpush3.xpose.msra.mxu0 %v84_v4  ;;  %366 = vmatpush3.bf16.msra.mxu1 %v394_v29 }
  0x36   :  { %334 = vmatprep.subr.mxu0 %v493_v0  ;;  %367 = vmatprep.subr.bf16.mxu1 %v493_v0 }
  0x39   :  { %335 = vmatpush3.xpose.msra.mxu0 %v83_v5  ;;  %368 = vmatpush3.bf16.msra.mxu1 %v395_v30 }
  0x3a   :  { %336 = vmatprep.subr.mxu0 %v493_v0  ;;  %369 = vmatprep.subr.bf16.mxu1 %v493_v0 }
  0x3d   :  { %337 = vmatpush3.xpose.msra.mxu0 %v82_v6  ;;  %370 = vmatpush3.bf16.msra.mxu1 %v396_v31 }
  0x3e   :  { %338 = vmatprep.subr.mxu0 %v493_v0  ;;  %371 = vmatprep.subr.bf16.mxu1 %v493_v0 }
  0x41   :  { %339 = vmatpush3.xpose.msra.mxu0 %v81_v7  ;;  %372 = vmatpush3.bf16.msra.mxu1 %v397_v32 }
  0x42   :  { %340 = vmatprep.subr.mxu0 %v493_v0  ;;  %373 = vmatprep.subr.bf16.mxu1 %v493_v0 }
  0x45   :  { %341 = vmatpush3.xpose.msra.mxu0 %v80_v8  ;;  %374 = vmatpush3.bf16.msra.mxu1 %v398_v33 }
  0x46   :  { %342 = vmatprep.subr.mxu0 %v493_v0  ;;  %375 = vmatprep.subr.bf16.mxu1 %v493_v0 }
  0x49   :  { %343 = vmatpush3.xpose.msra.mxu0 %v79_v9  ;;  %376 = vmatpush3.bf16.msra.mxu1 %v399_v38 }
  0x4a   :  { %344 = vmatprep.subr.mxu0 %v493_v0 }
  0x4d   :  { %345 = vmatpush3.xpose.msra.mxu0 %v78_v10 }
  0x4e   :  { %346 = vmatprep.subr.mxu0 %v493_v0 }
  0x51   :  { %347 = vmatpush3.xpose.msra.mxu0 %v77_v11 }
  0x52   :  { %348 = vmatprep.subr.mxu0 %v493_v0 }
  0x55   :  { %349 = vmatpush3.xpose.msra.mxu0 %v76_v12 }
  0x56   :  { %350 = vmatprep.subr.mxu0 %v493_v0 }
  0x59   :  { %351 = vmatpush3.xpose.msra.mxu0 %v75_v13 }
  0x5a   :  { %352 = vmatprep.subr.mxu0 %v493_v0 }
  0x5d   :  { %353 = vmatpush3.xpose.msra.mxu0 %v74_v14 }
  0x5e   :  { %354 = vmatprep.subr.mxu0 %v493_v0 }
  0x61   :  { %355 = vmatpush3.xpose.msra.mxu0 %v73_v15 }
  0x62   :  { %356 = vmatprep.subr.mxu0 %v493_v0 }
  0x65   :  { %357 = vmatpush3.xpose.msra.mxu0 %v72_v16 }
  0x68   :  { %359 = vmatmul.mubr.f32.vlgmr.msra.gmra.mxu0 %v55_v17 }
 0x128   :  { %v154_v20 = vpop.f32.mrf.mxu0 }
 0x129   :  { %v161_v21 = vsel %vm160_vm1, %v154_v20, inf }
 0x12a   :  { %162 = vmin.xlane.f32.xlu0 %v161_v21  ;;  %v360_v22 = vpop.f32.mrf.mxu0 }
 0x1b3   :  { %v163_v23 = vpop.xlane.xlu0 %162 }
 0x1b4   :  { %vm164_vm2 = vcmp.eq.f32.partialorder %v161_v21, %v163_v23 }
 0x1b5   :  { %v165_v24 = vsel %vm164_vm2, %v159_v19, 128 }
 0x1b6   :  { %v167_v25 = vshra.s32 %v165_v24, 16  ;;  %v166_v34 = vand.u32 65535, %v165_v24 }
 0x1b8   :  { %v169_v26 = vcvt.s32.f32 %v167_v25  ;;  %v168_v36 = vcvt.s32.f32 %v166_v34 }
 0x1ba   :  { %170 = vmin.xlane.f32.xlu0 %v169_v26 }
 0x243   :  { %v171_v35 = vpop.xlane.xlu0 %170 }
 0x244   :  { %vm172_vm3 = vcmp.eq.f32.partialorder %v169_v26, %v171_v35  ;;  %v177_v39 = vcvt.f32.s32 %v171_v35 }
 0x245   :  { %v173_v37 = vsel %vm172_vm3, %v168_v36, inf }
 0x246   :  { %174 = vmin.xlane.f32.xlu1 %v173_v37  ;;  %v178_v41 = vshll.u32 %v177_v39, 16 }
 0x2cf   :  { %v175_v40 = vpop.xlane.xlu1 %174 }
 0x2d0   :  { %v176_v42 = vcvt.f32.s32 %v175_v40 }
 0x2d2   :  { %v179_v43 = vadd.s32 %v178_v41, %v176_v42 }
 0x2d4   :  { %vm180_vm4 = vcmp.eq.s32.totalorder %v159_v19, %v179_v43 }
 0x2d5   :  { %vm298_vm5 = vmpackc.low %vm180_vm4, %vm180_vm4 }
 0x2d6   :  { %378 = vmatmul.mubr.msk.bf16.vlgmr.msra.gmra.mxu1 %vm298_vm5, %v495_v44 }
 0x396   :  { %v266_v45 = vpop.f32.mrf.mxu1 }
 0x397   :  { %272 = vst [vmem:[#allocation8] sm:$0xff] %v266_v45 }
 0x398   :  { %v379_v46 = vpop.f32.mrf.mxu1 }
 0x399   :  { %471 = shalt.err (!%p468_p5)
}
 0x39a   :  { %282 = dma.vmem_to_hbm [thread:$0]  %s280_s2, 128, %s558_s3, [#allocation4]   ;;  %v269_v47 = vpop.f32.mrf.mxu1 }
 0x39c   :  { %v380_v48 = vpop.f32.mrf.mxu1 }
 0x39d   :  { %484 = dma.done.wait [#allocation4], 128  }
 0x39e   :  { %485 = vsyncadd [#allocation4], 4294967168 }
 0x39f   :  { %286 = vsyncpa [#allocation3], 1 }
 0x3a0   :  { %287 = vsyncpa [#allocation6], 1 }
 0x3a1   :  { %288 = vsyncpa [#allocation4], 1 }

// kernel: tpu_custom_call.1
= control target key start
LH: loop header
LB: loop body
LE: loop exit
PB: predicated region body
PF: predicated region fallthrough
CT: control target
= control target key end

     0   :  { %8 = vsyncpa [#allocation3], 0  ;;  %s555_s0 = inlined_call_operand.hbm [shape: f32[8,128], index: 0, kind: input, shape index: {}]   ;;  %s556_s1 = inlined_call_operand.hbm [shape: f32[128,128], index: 1, kind: input, shape index: {}]   ;;  %s557_s2 = inlined_call_operand.hbm [shape: bf16[128,128], index: 2, kind: input, shape index: {}]   ;;  %s558_s3 = inlined_call_operand.hbm [shape: f32[8,128], index: 3, kind: output, shape index: {}]  }
   0x1   :  { %9 = vsyncpa [#allocation6], 0 }
   0x2   :  { %10 = vsyncpa [#allocation4], 0  ;;  %s486_s12 = smov [#allocation5]  }
   0x3   :  { %s26_s13 = sshll.u32 %s486_s12, 4  ;;  %s27_s13 = int_to_ptr.vmem [resolvable:$true] %s26_s13 }
   0x4   :  { %s408_s14 = scalar_lea.vmem %s27_s13, 2048  ;;  %p413_p1 = scmp.lt.s32.totalorder %s27_s13, %s27_s13 }
   0x5   :  { %p409_p0 = scmp.ne.s32.totalorder %s27_s13, %s408_s14  ;;  %p414_p2 = scmp.lt.s32.totalorder %s408_s14, %s408_s14 }
   0x7   :  { %p415_p3 = por %p414_p2, %p413_p1 }
   0x9   :  { %p416_p4 = pnand %p415_p3, %p409_p0 }
   0xb   :  { %419 = shalt.err (!%p416_p4)
}
   0xc   :  { %s487_s15 = smov 128   ;;  %s488_s16 = smov 8  }
   0xd   :  { %32 = dma.hbm_to_vmem [thread:$0]  %s556_s1, 2048, %s27_s13, [#allocation6], %s487_s15, %s487_s15, %s488_s16  }
   0xe   :  { %s489_s19 = smov [#allocation2]   ;;  %s490_s21 = smov [#allocation7]  }
   0xf   :  { %s17_s20 = sshll.u32 %s489_s19, 4  ;;  %s38_s22 = sshll.u32 %s490_s21, 4  ;;  %s18_s20 = int_to_ptr.vmem [resolvable:$true] %s17_s20  ;;  %s39_s22 = int_to_ptr.vmem [resolvable:$true] %s38_s22 }
  0x10   :  { %s428_s23 = scalar_lea.vmem %s18_s20, 128  ;;  %p433_p6 = scmp.lt.s32.totalorder %s18_s20, %s18_s20 }
  0x11   :  { %p429_p5 = scmp.ne.s32.totalorder %s18_s20, %s428_s23  ;;  %p434_p7 = scmp.lt.s32.totalorder %s428_s23, %s428_s23 }
  0x13   :  { %p435_p8 = por %p434_p7, %p433_p6 }
  0x15   :  { %p436_p9 = pnand %p435_p8, %p429_p5 }
  0x17   :  { %439 = shalt.err (!%p436_p9)
}
  0x18   :  { %20 = dma.hbm_to_vmem [thread:$0]  %s555_s0, 128, %s18_s20, [#allocation3]  }
  0x19   :  { %s448_s26 = scalar_lea.vmem %s39_s22, 1024  ;;  %p453_p11 = scmp.lt.s32.totalorder %s39_s22, %s39_s22 }
  0x1a   :  { %p449_p10 = scmp.ne.s32.totalorder %s39_s22, %s448_s26  ;;  %p454_p12 = scmp.lt.s32.totalorder %s448_s26, %s448_s26 }
  0x1c   :  { %p455_p13 = por %p454_p12, %p453_p11 }
  0x1e   :  { %p456_p0 = pnand %p455_p13, %p449_p10 }
  0x20   :  { %459 = shalt.err (!%p456_p0)
}
  0x21   :  { %s491_s1 = smov 64   ;;  %s492_s27 = smov 4  }
  0x22   :  { %44 = dma.hbm_to_vmem [thread:$0]  %s557_s2, 1024, %s39_s22, [#allocation6], %s491_s1, %s491_s1, %s492_s27  }
  0x23   :  { %480 = dma.done.wait [#allocation3], 128  }
  0x24   :  { %481 = vsyncadd [#allocation3], 4294967168 }
  0x25   :  { %482 = dma.done.wait [#allocation6], 3072  }
  0x26   :  { %483 = vsyncadd [#allocation6], 4294964224  ;;  %v493_v0 = vmov 0.0   ;;  %vm494_vm0 = vmmov 0   ;;  %v87_v1 = vld [vmem:[#allocation5 + $0x78] sm:$0xff]  ;;  %v86_v2 = vld [vmem:[#allocation5 + $0x70] sm:$0xff]  ;;  %v158_v18 = vlaneseq }
  0x27   :  { %326 = vmatprep.subr.mxu0 %v493_v0  ;;  %358 = vmatprep.mubr.msk.f32.mxu0 %vm494_vm0, %v493_v0  ;;  %v85_v3 = vld [vmem:[#allocation5 + $0x68] sm:$0xff]  ;;  %v84_v4 = vld [vmem:[#allocation5 + $0x60] sm:$0xff]  ;;  %v83_v5 = vld [vmem:[#allocation5 + $0x58] sm:$0xff]  ;;  %v495_v44 = vmov 1.0|1.0   ;;  %s496_s0 = smov [#allocation8]  }
  0x28   :  { %361 = vmatprep.subr.bf16.mxu1 %v493_v0  ;;  %377 = vmatprep.mubr.msk.bf16.mxu1 %vm494_vm0, %v493_v0  ;;  %v82_v6 = vld [vmem:[#allocation5 + $0x50] sm:$0xff]  ;;  %v81_v7 = vld [vmem:[#allocation5 + $0x48] sm:$0xff]  ;;  %v80_v8 = vld [vmem:[#allocation5 + $0x40] sm:$0xff]  ;;  %v159_v19 = vand.u32 127, %v158_v18  ;;  %s279_s2 = sshll.u32 %s496_s0, 4  ;;  %s280_s2 = int_to_ptr.vmem [resolvable:$true] %s279_s2 }
  0x29   :  { %327 = vmatpush3.xpose.msra.mxu0 %v87_v1  ;;  %v79_v9 = vld [vmem:[#allocation5 + $0x38] sm:$0xff]  ;;  %v78_v10 = vld [vmem:[#allocation5 + $0x30] sm:$0xff]  ;;  %v77_v11 = vld [vmem:[#allocation5 + $0x28] sm:$0xff]  ;;  %s460_s30 = scalar_lea.vmem %s280_s2, 128  ;;  %p465_p2 = scmp.lt.s32.totalorder %s280_s2, %s280_s2 }
  0x2a   :  { %328 = vmatprep.subr.mxu0 %v493_v0  ;;  %v76_v12 = vld [vmem:[#allocation5 + $0x20] sm:$0xff]  ;;  %v75_v13 = vld [vmem:[#allocation5 + $0x18] sm:$0xff]  ;;  %v74_v14 = vld [vmem:[#allocation5 + $0x10] sm:$0xff]  ;;  %vm160_vm1 = vcmp.lt.s32.totalorder %v159_v19, 16  ;;  %p461_p1 = scmp.ne.s32.totalorder %s280_s2, %s460_s30  ;;  %p466_p3 = scmp.lt.s32.totalorder %s460_s30, %s460_s30 }
  0x2b   :  { %v73_v15 = vld [vmem:[#allocation5 + $0x8] sm:$0xff]  ;;  %v72_v16 = vld [vmem:[#allocation5] sm:$0xff]  ;;  %v55_v17 = vld [vmem:[#allocation2] sm:$0xff] }
  0x2c   :  { %v392_v27 = vld [vmem:[#allocation7 + $0x38] sm:$0xff]   ;;  %v393_v28 = vld [vmem:[#allocation7 + $0x30] sm:$0xff]   ;;  %v394_v29 = vld [vmem:[#allocation7 + $0x28] sm:$0xff]   ;;  %p467_p4 = por %p466_p3, %p465_p2 }
  0x2d   :  { %329 = vmatpush3.xpose.msra.mxu0 %v86_v2  ;;  %362 = vmatpush3.bf16.msra.mxu1 %v392_v27  ;;  %v395_v30 = vld [vmem:[#allocation7 + $0x20] sm:$0xff]   ;;  %v396_v31 = vld [vmem:[#allocation7 + $0x18] sm:$0xff]   ;;  %v397_v32 = vld [vmem:[#allocation7 + $0x10] sm:$0xff]  }
  0x2e   :  { %330 = vmatprep.subr.mxu0 %v493_v0  ;;  %363 = vmatprep.subr.bf16.mxu1 %v493_v0  ;;  %v398_v33 = vld [vmem:[#allocation7 + $0x8] sm:$0xff]   ;;  %v399_v38 = vld [vmem:[#allocation7] sm:$0xff]   ;;  %p468_p5 = pnand %p467_p4, %p461_p1 }
  0x31   :  { %331 = vmatpush3.xpose.msra.mxu0 %v85_v3  ;;  %364 = vmatpush3.bf16.msra.mxu1 %v393_v28 }
  0x32   :  { %332 = vmatprep.subr.mxu0 %v493_v0  ;;  %365 = vmatprep.subr.bf16.mxu1 %v493_v0 }
  0x35   :  { %333 = vmatpush3.xpose.msra.mxu0 %v84_v4  ;;  %366 = vmatpush3.bf16.msra.mxu1 %v394_v29 }
  0x36   :  { %334 = vmatprep.subr.mxu0 %v493_v0  ;;  %367 = vmatprep.subr.bf16.mxu1 %v493_v0 }
  0x39   :  { %335 = vmatpush3.xpose.msra.mxu0 %v83_v5  ;;  %368 = vmatpush3.bf16.msra.mxu1 %v395_v30 }
  0x3a   :  { %336 = vmatprep.subr.mxu0 %v493_v0  ;;  %369 = vmatprep.subr.bf16.mxu1 %v493_v0 }
  0x3d   :  { %337 = vmatpush3.xpose.msra.mxu0 %v82_v6  ;;  %370 = vmatpush3.bf16.msra.mxu1 %v396_v31 }
  0x3e   :  { %338 = vmatprep.subr.mxu0 %v493_v0  ;;  %371 = vmatprep.subr.bf16.mxu1 %v493_v0 }
  0x41   :  { %339 = vmatpush3.xpose.msra.mxu0 %v81_v7  ;;  %372 = vmatpush3.bf16.msra.mxu1 %v397_v32 }
  0x42   :  { %340 = vmatprep.subr.mxu0 %v493_v0  ;;  %373 = vmatprep.subr.bf16.mxu1 %v493_v0 }
  0x45   :  { %341 = vmatpush3.xpose.msra.mxu0 %v80_v8  ;;  %374 = vmatpush3.bf16.msra.mxu1 %v398_v33 }
  0x46   :  { %342 = vmatprep.subr.mxu0 %v493_v0  ;;  %375 = vmatprep.subr.bf16.mxu1 %v493_v0 }
  0x49   :  { %343 = vmatpush3.xpose.msra.mxu0 %v79_v9  ;;  %376 = vmatpush3.bf16.msra.mxu1 %v399_v38 }
  0x4a   :  { %344 = vmatprep.subr.mxu0 %v493_v0 }
  0x4d   :  { %345 = vmatpush3.xpose.msra.mxu0 %v78_v10 }
  0x4e   :  { %346 = vmatprep.subr.mxu0 %v493_v0 }
  0x51   :  { %347 = vmatpush3.xpose.msra.mxu0 %v77_v11 }
  0x52   :  { %348 = vmatprep.subr.mxu0 %v493_v0 }
  0x55   :  { %349 = vmatpush3.xpose.msra.mxu0 %v76_v12 }
  0x56   :  { %350 = vmatprep.subr.mxu0 %v493_v0 }
  0x59   :  { %351 = vmatpush3.xpose.msra.mxu0 %v75_v13 }
  0x5a   :  { %352 = vmatprep.subr.mxu0 %v493_v0 }
  0x5d   :  { %353 = vmatpush3.xpose.msra.mxu0 %v74_v14 }
  0x5e   :  { %354 = vmatprep.subr.mxu0 %v493_v0 }
  0x61   :  { %355 = vmatpush3.xpose.msra.mxu0 %v73_v15 }
  0x62   :  { %356 = vmatprep.subr.mxu0 %v493_v0 }
  0x65   :  { %357 = vmatpush3.xpose.msra.mxu0 %v72_v16 }
  0x68   :  { %359 = vmatmul.mubr.f32.vlgmr.msra.gmra.mxu0 %v55_v17 }
 0x128   :  { %v154_v20 = vpop.f32.mrf.mxu0 }
 0x129   :  { %v161_v21 = vsel %vm160_vm1, %v154_v20, inf }
 0x12a   :  { %162 = vmin.xlane.f32.xlu0 %v161_v21  ;;  %v360_v22 = vpop.f32.mrf.mxu0 }
 0x1b3   :  { %v163_v23 = vpop.xlane.xlu0 %162 }
 0x1b4   :  { %vm164_vm2 = vcmp.eq.f32.partialorder %v161_v21, %v163_v23 }
 0x1b5   :  { %v165_v24 = vsel %vm164_vm2, %v159_v19, 128 }
 0x1b6   :  { %v167_v25 = vshra.s32 %v165_v24, 16  ;;  %v166_v34 = vand.u32 65535, %v165_v24 }
 0x1b8   :  { %v169_v26 = vcvt.s32.f32 %v167_v25  ;;  %v168_v36 = vcvt.s32.f32 %v166_v34 }
 0x1ba   :  { %170 = vmin.xlane.f32.xlu0 %v169_v26 }
 0x243   :  { %v171_v35 = vpop.xlane.xlu0 %170 }
 0x244   :  { %vm172_vm3 = vcmp.eq.f32.partialorder %v169_v26, %v171_v35  ;;  %v177_v39 = vcvt.f32.s32 %v171_v35 }
 0x245   :  { %v173_v37 = vsel %vm172_vm3, %v168_v36, inf }
 0x246   :  { %174 = vmin.xlane.f32.xlu1 %v173_v37  ;;  %v178_v41 = vshll.u32 %v177_v39, 16 }
 0x2cf   :  { %v175_v40 = vpop.xlane.xlu1 %174 }
 0x2d0   :  { %v176_v42 = vcvt.f32.s32 %v175_v40 }
 0x2d2   :  { %v179_v43 = vadd.s32 %v178_v41, %v176_v42 }
 0x2d4   :  { %vm180_vm4 = vcmp.eq.s32.totalorder %v159_v19, %v179_v43 }
 0x2d5   :  { %vm298_vm5 = vmpackc.low %vm180_vm4, %vm180_vm4 }
 0x2d6   :  { %378 = vmatmul.mubr.msk.bf16.vlgmr.msra.gmra.mxu1 %vm298_vm5, %v495_v44 }
 0x396   :  { %v266_v45 = vpop.f32.mrf.mxu1 }
 0x397   :  { %272 = vst [vmem:[#allocation8] sm:$0xff] %v266_v45 }
 0x398   :  { %v379_v46 = vpop.f32.mrf.mxu1 }
 0x399   :  { %471 = shalt.err (!%p468_p5)
}
 0x39a   :  { %282 = dma.vmem_to_hbm [thread:$0]  %s280_s2, 128, %s558_s3, [#allocation4]   ;;  %v269_v47 = vpop.f32.mrf.mxu1 }
 0x39c   :  { %v380_v48 = vpop.f32.mrf.mxu1 }
 0x39d   :  { %484 = dma.done.wait [#allocation4], 128  }
 0x39e   :  { %485 = vsyncadd [#allocation4], 4294967168 }
 0x39f   :  { %286 = vsyncpa [#allocation3], 1 }
 0x3a0   :  { %287 = vsyncpa [#allocation6], 1 }
 0x3a1   :  { %288 = vsyncpa [#allocation4], 1 }

</bundles_post_ra>
